<compile_context>
chip_gen: v7x
topology: tpu7x:2x2x1
jax: 0.10.0
libtpu: 0.0.40
codegen_flags: <defaults>
</compile_context>

<pallas_src>
import functools

import jax
import jax.numpy as jnp
from jax.experimental import pallas as pl
from jax.experimental.pallas import tpu as pltpu


def se_outline_kernel(x_ref, w1_ref, w2_ref, out_ref, acc_ref, *, inv_hw):
    # x_ref:   (1, C, TS)   one batch element, one spatial tile (lane-dense TS)
    # w1_ref:  (C_r, C)     fc1.weight (PyTorch layout, bias=False)
    # w2_ref:  (C, C_r)     fc2.weight (PyTorch layout, bias=False)
    # out_ref: (1, C, 1)    sigmoid gate for this batch element
    # acc_ref: (C, 1) f32   running spatial sum (persists across spatial axis)
    s = pl.program_id(1)

    @pl.when(s == 0)
    def _init():
        acc_ref[...] = jnp.zeros_like(acc_ref)

    # Partial spatial sum for this tile: lane-axis (XLU) reduction, hidden
    # under the HBM DMA of the next tile for this memory-bound kernel.
    xt = x_ref[0]                                            # (C, TS)
    acc_ref[...] += jnp.sum(xt.astype(jnp.float32), axis=1, keepdims=True)

    @pl.when(s == pl.num_programs(1) - 1)
    def _finish():
        pooled = acc_ref[...] * inv_hw                       # (C, 1) global mean
        y1 = jnp.dot(w1_ref[...], pooled,
                     preferred_element_type=jnp.float32)     # (C_r, 1)
        y1 = jnp.maximum(y1, 0.0)                            # ReLU
        y2 = jnp.dot(w2_ref[...], y1,
                     preferred_element_type=jnp.float32)     # (C, 1)
        gate = 1.0 / (1.0 + jnp.exp(-y2))                    # Sigmoid (EUP exp)
        out_ref[...] = gate.reshape(out_ref.shape).astype(out_ref.dtype)


def _choose_spatial_tile(c, hw, itemsize=4, budget_bytes=4 * 1024 * 1024):
    """Largest multiple of 128 dividing HW whose (C, TS) slab fits the budget."""
    if hw % 128 != 0:
        return hw  # block must equal the full dim if it is not lane-aligned
    best = 128
    t = 128
    while t <= hw:
        if hw % t == 0 and c * t * itemsize <= budget_bytes:
            best = t
        t += 128
    return best


def se_outline_forward(x_nchw, w_fc1, w_fc2, *, spatial_tile=None):
    """Pallas forward of SE_outline.

    x_nchw: (N, C, H, W)
    w_fc1:  (C // ratio, C)   fc1.weight (bias=False)
    w_fc2:  (C, C // ratio)   fc2.weight (bias=False)
    returns (N, C, 1, 1) sigmoid gate (the module returns only the gate).
    """
    n, c, h, w = x_nchw.shape
    c_r = w_fc1.shape[0]
    assert w_fc1.shape == (c_r, c) and w_fc2.shape == (c, c_r)

    hw = h * w
    x_flat = jnp.asarray(x_nchw, jnp.float32).reshape(n, c, hw)  # free reshape

    ts = spatial_tile if spatial_tile is not None else _choose_spatial_tile(c, hw)
    assert hw % ts == 0 and (ts == hw or ts % 128 == 0)
    n_s = hw // ts

    kernel = functools.partial(se_outline_kernel, inv_hw=1.0 / float(hw))

    out = pl.pallas_call(
        kernel,
        out_shape=jax.ShapeDtypeStruct((n, c, 1), jnp.float32),
        grid_spec=pltpu.PrefetchScalarGridSpec(
            num_scalar_prefetch=0,
            grid=(n, n_s),
            in_specs=[
                pl.BlockSpec((1, c, ts), lambda b, s: (b, 0, s)),
                pl.BlockSpec((c_r, c), lambda b, s: (0, 0)),
                pl.BlockSpec((c, c_r), lambda b, s: (0, 0)),
            ],
            out_specs=pl.BlockSpec((1, c, 1), lambda b, s: (b, 0, 0)),
            scratch_shapes=[pltpu.VMEM((c, 1), jnp.float32)],
        ),
        compiler_params=pltpu.CompilerParams(
            dimension_semantics=("parallel", "arbitrary")),
    )(x_flat, jnp.asarray(w_fc1, jnp.float32), jnp.asarray(w_fc2, jnp.float32))

    return out.reshape(n, c, 1, 1)


def se_outline_reference(x_nchw, w_fc1, w_fc2):
    """Pure-JAX reference matching the PyTorch module."""
    n, c, _, _ = x_nchw.shape
    y = jnp.mean(jnp.asarray(x_nchw, jnp.float32), axis=(2, 3))  # avgpool + view
    y = jnp.maximum(y @ w_fc1.T, 0.0)                            # fc1 + ReLU
    y = jax.nn.sigmoid(y @ w_fc2.T)                              # fc2 + Sigmoid
    return y.reshape(n, c, 1, 1)


if __name__ == "__main__":
    key = jax.random.PRNGKey(0)
    kx, k1, k2 = jax.random.split(key, 3)

    N, C, H, W, RATIO = 2, 8, 16, 16, 4
    C_R = C // RATIO

    x = jax.random.normal(kx, (N, C, H, W), jnp.float32)
    w_fc1 = 0.3 * jax.random.normal(k1, (C_R, C), jnp.float32)   # fc1.weight
    w_fc2 = 0.3 * jax.random.normal(k2, (C, C_R), jnp.float32)   # fc2.weight

    ref = jax.block_until_ready(se_outline_reference(x, w_fc1, w_fc2))

    # Default tiling (single spatial tile at this size).
    out = jax.block_until_ready(se_outline_forward(x, w_fc1, w_fc2))
    assert out.shape == (N, C, 1, 1)
    assert jnp.allclose(out, ref, atol=1e-5, rtol=1e-5), (
        float(jnp.max(jnp.abs(out - ref))))

    # Force 2 spatial tiles to exercise the grid-reduction / accumulator path.
    out_tiled = jax.block_until_ready(
        se_outline_forward(x, w_fc1, w_fc2, spatial_tile=128))
    assert jnp.allclose(out_tiled, ref, atol=1e-5, rtol=1e-5), (
        float(jnp.max(jnp.abs(out_tiled - ref))))

    print("KERNEL_OK")
</pallas_src>

<mosaic_0001>
module attributes {stable_mosaic.version = 11 : i64} {
  func.func @se_outline_kernel(%arg0: i32, %arg1: i32, %arg2: memref<1x8x256xf32, #tpu.memory_space<vmem>>, %arg3: memref<2x8xf32, #tpu.memory_space<vmem>>, %arg4: memref<8x2xf32, #tpu.memory_space<vmem>>, %arg5: memref<1x8x1xf32, #tpu.memory_space<vmem>>, %arg6: memref<8x1xf32, #tpu.memory_space<vmem>>) attributes {dimension_semantics = [#tpu.dimension_semantics<parallel>, #tpu.dimension_semantics<arbitrary>], iteration_bounds = array<i64: 2, 1>, scalar_prefetch = 0 : i64, scratch_operands = 1 : i64, tpu.core_type = #tpu.core_type<tc>, window_params = [{transform_indices = @transform_0, window_bounds = array<i64: 1, 8, 256>}, {pipeline_mode = #tpu.pipeline_mode<synchronous>, transform_indices = @transform_1, window_bounds = array<i64: 2, 8>}, {pipeline_mode = #tpu.pipeline_mode<synchronous>, transform_indices = @transform_2, window_bounds = array<i64: 8, 2>}, {transform_indices = @transform_3, window_bounds = array<i64: 1, 8, 1>}]} {
    %c0_i32 = arith.constant 0 : i32
    %0 = arith.cmpi eq, %arg1, %c0_i32 : i32
    %1 = arith.extui %0 : i1 to i32
    %c0_i32_0 = arith.constant 0 : i32
    %2 = arith.cmpi ne, %1, %c0_i32_0 : i32
    scf.if %2 {
      %cst_9 = arith.constant 0.000000e+00 : f32
      %13 = vector.broadcast %cst_9 : f32 to vector<8x1xf32>
      %c0_10 = arith.constant 0 : index
      %c0_11 = arith.constant 0 : index
      %14 = vector.load %arg6[%c0_10, %c0_11] : memref<8x1xf32, #tpu.memory_space<vmem>>, vector<8x1xf32>
      tpu.vector_store %arg6[%c0_10, %c0_11], %13 {strides = array<i32>} : memref<8x1xf32, #tpu.memory_space<vmem>>, vector<8x1xf32>,
    } else {
    }
    %c0 = arith.constant 0 : index
    %c0_1 = arith.constant 0 : index
    %c0_2 = arith.constant 0 : index
    %3 = vector.load %arg2[%c0, %c0_1, %c0_2] : memref<1x8x256xf32, #tpu.memory_space<vmem>>, vector<1x8x256xf32>
    %4 = vector.shape_cast %3 : vector<1x8x256xf32> to vector<8x256xf32>
    %c0_3 = arith.constant 0 : index
    %c0_4 = arith.constant 0 : index
    %5 = vector.load %arg6[%c0_3, %c0_4] : memref<8x1xf32, #tpu.memory_space<vmem>>, vector<8x1xf32>
    %cst = arith.constant dense<0.000000e+00> : vector<8xf32>
    %6 = vector.multi_reduction <add>, %4, %cst [1] : vector<8x256xf32> to vector<8xf32>
    %7 = vector.shape_cast %6 : vector<8xf32> to vector<8x1xf32>
    %8 = arith.addf %5, %7 : vector<8x1xf32>
    %c0_5 = arith.constant 0 : index
    %c0_6 = arith.constant 0 : index
    %9 = vector.load %arg6[%c0_5, %c0_6] : memref<8x1xf32, #tpu.memory_space<vmem>>, vector<8x1xf32>
    tpu.vector_store %arg6[%c0_5, %c0_6], %8 {strides = array<i32>} : memref<8x1xf32, #tpu.memory_space<vmem>>, vector<8x1xf32>,
    %c0_i32_7 = arith.constant 0 : i32
    %10 = arith.cmpi eq, %arg1, %c0_i32_7 : i32
    %11 = arith.extui %10 : i1 to i32
    %c0_i32_8 = arith.constant 0 : i32
    %12 = arith.cmpi ne, %11, %c0_i32_8 : i32
    scf.if %12 {
      %c0_9 = arith.constant 0 : index
      %c0_10 = arith.constant 0 : index
      %13 = vector.load %arg6[%c0_9, %c0_10] : memref<8x1xf32, #tpu.memory_space<vmem>>, vector<8x1xf32>
      %cst_11 = arith.constant 3.906250e-03 : f32
      %14 = vector.broadcast %cst_11 : f32 to vector<8x1xf32>
      %15 = arith.mulf %13, %14 : vector<8x1xf32>
      %c0_12 = arith.constant 0 : index
      %c0_13 = arith.constant 0 : index
      %16 = vector.load %arg3[%c0_12, %c0_13] : memref<2x8xf32, #tpu.memory_space<vmem>>, vector<2x8xf32>
      %cst_14 = arith.constant dense<0.000000e+00> : vector<2x1xf32>
      %17 = tpu.matmul %16, %15, %cst_14 {dimension_numbers = #tpu.dot_dimension_numbers<[1], [0], [0], [1], [0, 0, 1, 1], [], []>} : vector<2x8xf32>, vector<8x1xf32>, vector<2x1xf32> -> vector<2x1xf32>
      %cst_15 = arith.constant 0.000000e+00 : f32
      %18 = vector.broadcast %cst_15 : f32 to vector<2x1xf32>
      %19 = arith.maximumf %17, %18 : vector<2x1xf32>
      %c0_16 = arith.constant 0 : index
      %c0_17 = arith.constant 0 : index
      %20 = vector.load %arg4[%c0_16, %c0_17] : memref<8x2xf32, #tpu.memory_space<vmem>>, vector<8x2xf32>
      %cst_18 = arith.constant dense<0.000000e+00> : vector<8x1xf32>
      %21 = tpu.matmul %20, %19, %cst_18 {dimension_numbers = #tpu.dot_dimension_numbers<[1], [0], [0], [1], [0, 0, 1, 1], [], []>} : vector<8x2xf32>, vector<2x1xf32>, vector<8x1xf32> -> vector<8x1xf32>
      %cst_19 = arith.constant 0.000000e+00 : f32
      %22 = vector.broadcast %cst_19 : f32 to vector<8x1xf32>
      %23 = arith.subf %22, %21 : vector<8x1xf32>
      %24 = math.exp %23 : vector<8x1xf32>
      %cst_20 = arith.constant 1.000000e+00 : f32
      %25 = vector.broadcast %cst_20 : f32 to vector<8x1xf32>
      %26 = arith.addf %25, %24 : vector<8x1xf32>
      %cst_21 = arith.constant 1.000000e+00 : f32
      %27 = vector.broadcast %cst_21 : f32 to vector<8x1xf32>
      %28 = arith.divf %27, %26 : vector<8x1xf32>
      %29 = vector.shape_cast %28 : vector<8x1xf32> to vector<1x8x1xf32>
      %c0_22 = arith.constant 0 : index
      %c0_23 = arith.constant 0 : index
      %c0_24 = arith.constant 0 : index
      %30 = vector.load %arg5[%c0_22, %c0_23, %c0_24] : memref<1x8x1xf32, #tpu.memory_space<vmem>>, vector<1x8x1xf32>
      tpu.vector_store %arg5[%c0_22, %c0_23, %c0_24], %29 {strides = array<i32>} : memref<1x8x1xf32, #tpu.memory_space<vmem>>, vector<1x8x1xf32>,
    } else {
    }
    return
  }
  func.func @transform_0(%arg0: i32, %arg1: i32) -> (i32, i32, i32) {
    %c0_i32 = arith.constant 0 : i32
    %c0_i32_0 = arith.constant 0 : i32
    return %arg0, %c0_i32, %arg1 : i32, i32, i32
  }
  func.func @transform_1(%arg0: i32, %arg1: i32) -> (i32, i32) {
    %c0_i32 = arith.constant 0 : i32
    %c0_i32_0 = arith.constant 0 : i32
    %c0_i32_1 = arith.constant 0 : i32
    return %c0_i32, %c0_i32_0 : i32, i32
  }
  func.func @transform_2(%arg0: i32, %arg1: i32) -> (i32, i32) {
    %c0_i32 = arith.constant 0 : i32
    %c0_i32_0 = arith.constant 0 : i32
    %c0_i32_1 = arith.constant 0 : i32
    return %c0_i32, %c0_i32_0 : i32, i32
  }
  func.func @transform_3(%arg0: i32, %arg1: i32) -> (i32, i32, i32) {
    %c0_i32 = arith.constant 0 : i32
    %c0_i32_0 = arith.constant 0 : i32
    %c0_i32_1 = arith.constant 0 : i32
    return %arg0, %c0_i32, %c0_i32_0 : i32, i32, i32
  }
}

</mosaic_0001>

<bundles_post_ra>
// kernel: tpu_custom_call.1
= control target key start
LH: loop header
LB: loop body
LE: loop exit
PB: predicated region body
PF: predicated region fallthrough
CT: control target
= control target key end

     0   :  { %8 = vsyncpa [#allocation4], 0  ;;  %s792_s0 = inlined_call_operand.hbm [shape: f32[2,8,256], index: 0, kind: input, shape index: {}]   ;;  %s793_s1 = inlined_call_operand.vmem [shape: f32[2,8], index: 1, kind: input, shape index: {}]   ;;  %s794_s2 = inlined_call_operand.vmem [shape: f32[8,2], index: 2, kind: input, shape index: {}]   ;;  %s795_s3 = inlined_call_operand.vmem [shape: f32[2,8,1], index: 3, kind: output, shape index: {}]  }
   0x1   :  { %10 = vsyncpa [#allocation4 + $0x1], 0  ;;  %s658_s12 = smov 0   ;;  %s660_s13 = smov 0  }
   0x2   :  { %s662_s14 = smov 0   ;;  %s664_s15 = smov 0  }
   0x3   :  { %s666_s16 = smov 0   ;;  %s668_s17 = smov 0  }
   0x4 LB: > { %s462_s18 = sadd.s32 4294967295, %s633_s17   ;;  %s28_s19 = sadd.s32 1, %s629_s16  ;;  %s633_s17 = sphi %s668_s17, %s16_s17   ;;  %s629_s16 = sphi %s666_s16, %s805_s16   ;;  %s625_s15 = sphi %s664_s15, %s804_s15   ;;  %s621_s14 = sphi %s662_s14, %s803_s14   ;;  %s617_s13 = sphi %s660_s13, %s802_s13   ;;  %s613_s12 = sphi %s658_s12, %s801_s12  }
   0x5   : > { %p30_p0 = scmp.ge.s32.totalorder %s28_s19, 2  ;;  %s37_s20 = sadd.s32 1, %s621_s14 }
   0x6   : > { %p44_p1 = scmp.ne.s32.totalorder %s621_s14, %s617_s13  ;;  %p45_p2 = scmp.eq.s32.totalorder %s633_s17, 0 }
   0x7   : > { %s807_s19 = smov (%p30_p0, %s28_s19), 0  ;;  %p50_p4 = scmp.ne.s32.totalorder %s617_s13, %s613_s12 }
   0x8   : > { %p694_p3 = por %p45_p2, %p44_p1  ;;  %s32_s22 = ssub.s32 %s629_s16, %s807_s19 }
   0x9   : > { %p51_p5 = scmp.eq.s32.totalorder %s462_s18, 0  ;;  %p35_p6 = scmp.eq.s32.totalorder %s32_s22, 0 }
   0xa   : > { %p498_p8 = scmp.lt.s32.totalorder %s633_s17, 2  ;;  %s148_s25 = sand.u32 1, %s621_s14  }
   0xb   : > { %p701_p7 = por %p51_p5, %p50_p4  ;;  %s477_s26 = sshll.u32 %s629_s16, 8 }
   0xc   : > { %s707_s24 = scalar_select %p35_p6, %s621_s14, %s37_s20  }
   0xd   : > { %s466_s27 = sshll.u32 %s148_s25, 4  ;;  %s714_s30 = scalar_lea.hbm %s792_s0, %s477_s26 }
   0xe   : > { %s152_s4 = scalar_lea.vmem [#allocation3], %s466_s27  ;;  %p718_p9 = pnand %p498_p8, %p694_p3 }
   0xf   : > { %s162_s5 = sshll.u32 %s152_s4, 4  ;;  %s149_s7 = scalar_lea.sflag [#allocation4], %s148_s25  ;;  %s722_s5 = int_to_ptr.vmem [resolvable:$true] %s162_s5 }
  0x10   : > { %s553_s8 = scalar_lea.hbm %s714_s30, 256  ;;  %p555_p13 = pneg %p718_p9 }
  0x11   : > { %p554_p12 = scmp.ne.s32.totalorder %s714_s30, %s553_s8  ;;  %s558_s11 = scalar_lea.hbm %s792_s0, 512 }
  0x12   : > { %p559_p2 = scmp.lt.u32.totalorder %s714_s30, %s792_s0  ;;  %p560_p3 = scmp.lt.u32.totalorder %s558_s11, %s553_s8 }
  0x13   : > { %p556_p0 = pnand %p555_p13, %p554_p12  ;;  %p562_p5 = scmp.lt.u32.totalorder %s553_s8, %s714_s30 }
  0x14   : > { %p561_p4 = por %p560_p3, %p559_p2 }
  0x15   : > { %p557_p1 = pneg %p556_p0 }
  0x16   : > { %p563_p6 = por %p562_p5, %p561_p4 }
  0x18   : > { %p564_p8 = pnand %p563_p6, %p557_p1 }
  0x1a   : > { %567 = shalt.err (!%p564_p8)
}
  0x1b   : > { %s568_s20 = scalar_lea.vmem %s722_s5, 256  ;;  %s635_s21 = smov [#allocation3]  }
  0x1c   : > { %p569_p12 = scmp.ne.s32.totalorder %s722_s5, %s568_s20  ;;  %s573_s22 = sshll.u32 %s635_s21, 4  ;;  %s574_s22 = int_to_ptr.vmem [resolvable:$false] %s573_s22 }
  0x1d   : > { %s575_s25 = scalar_lea.vmem %s574_s22, 512  ;;  %p576_p11 = scmp.lt.s32.totalorder %s722_s5, %s574_s22 }
  0x1e   : > { %p571_p0 = pnand %p569_p12, %p555_p13  ;;  %p577_p2 = scmp.lt.s32.totalorder %s575_s25, %s568_s20 }
  0x20   : > { %p572_p10 = pneg %p571_p0  ;;  %p578_p3 = por %p577_p2, %p576_p11 }
  0x22   : > { %p579_p4 = pnand %p578_p3, %p572_p10 }
  0x24   : > { %582 = shalt.err (!%p579_p4)
}
  0x25   : > { %497 = dma.hbm_to_vmem [thread:$0]  (!%p718_p9), %s714_s30, 256, %s722_s5, %s149_s7  }
  0x26   : > { %p799_p1 = scmp.lt.s32.totalorder %s633_s17, 3  ;;  %p800_p5 = scmp.ge.s32.totalorder %s633_s17, 1 }
  0x28   : > { %p168_p13 = pnand %p800_p5, %p799_p1 }
  0x29   : > { %s173_s26 = sand.u32 (!%p168_p13), 1, %s617_s13  }
  0x2a   : > { %171 = sbr.rel (%p168_p13) target bundleno = 664 (0x298), region = 32  ;;  %s470_s27 = sshll.u32 (!%p168_p13), %s173_s26, 4 }
  0x2b   : > { %s174_s28 = scalar_lea.sflag (!%p168_p13), [#allocation4], %s173_s26  ;;  %s177_s29 = scalar_lea.vmem (!%p168_p13), [#allocation3], %s470_s27 }
  0x31   : > { %608 = dma.done.wait (%p701_p7), %s174_s28, 256  }
  0x32   : > { %610 = vsyncadd (%p701_p7), %s174_s28, 4294967040  ;;  %vm208_vm0 = vcmask 7168   ;;  %v636_v0 = vmov 0.0   ;;  %v210_v1 = vld [vmem:[%s177_s29] sm:$0xff]  ;;  %v211_v2 = vld [vmem:[%s177_s29 + $0x8] sm:$0xff]  ;;  %vm637_vm1 = vmmov 0  }
  0x33   : > { %209 = vst.msk [vmem:[#allocation2] sm:$0xff] %vm208_vm0, %v636_v0  ;;  %482 = vmatprep.subr.mxu0 %v636_v0  ;;  %487 = vmatprep.subr.mxu1 %v636_v0  ;;  %v213_v3 = vadd.f32 %v211_v2, %v210_v1  ;;  %v224_v9 = vld [vmem:[%s793_s1] sm:$0x3]  ;;  %vm225_vm2 = vcmask 64512   ;;  %vm305_vm3 = vcmask 1041408   ;;  %vm301_vm4 = vcmask 15360  }
  0x34   : > { %484 = vmatprep.mubr.msk.f32.mxu0 %vm637_vm1, %v636_v0  ;;  %489 = vmatprep.mubr.msk.f32.mxu1 %vm637_vm1, %v636_v0  ;;  %v300_v13 = vld [vmem:[%s794_s2] sm:$0xff]  ;;  %p200_p7 = scmp.lt.s32.totalorder %s625_s15, 1 }
  0x35   : > { %214 = vadd.xlane.f32.xlu0 %v213_v3 }
  0x36   : > { %s809_s15 = smov (!%p200_p7, %s625_s15), 1 }
  0x37   : > { %s471_s6 = sshll.u32 %s809_s15, 3 }
  0x38   : > { %s203_s9 = scalar_lea.vmem %s795_s3, %s471_s6 }
  0x3a   : > { %v212_v4 = vld [vmem:[#allocation2] sm:$0xff] }
  0xc2   : > { %v215_v5 = vpop.xlane.xlu0 %214 }
  0xc3   : > { %v216_v6 = vadd.f32 %v215_v5, %v212_v4 }
  0xc5   : > { %218 = vst.msk [vmem:[#allocation2] sm:$0xff] %vm208_vm0, %v216_v6 }
  0xcc   : > { %v222_v7 = vld [vmem:[#allocation2] sm:$0xff] }
  0xcd   : > { %v223_v8 = vmul.f32 0.00390625, %v222_v7 }
  0xcf   : > { %483 = vmatpush3.msra.mxu0 %v223_v8 }
  0xd0   : > { %485 = vmatmul.mubr.msk.f32.vlgmr.msra.gmra.mrb[0].mxu0 %vm225_vm2, %v224_v9 }
 0x1a3   : > { %v295_v10 = vpop.f32.mrb[0].mxu0 }
 0x1a4   : > { %v299_v11 = vmax.f32 %v295_v10, 0.0  ;;  %v486_v12 = vpop.f32.mrb[1].mxu0 }
 0x1a6   : > { %488 = vmatpush3.msk.msra.mxu1 %vm305_vm3, %v299_v11 }
 0x1a7   : > { %490 = vmatmul.mubr.msk.f32.vlgmr.msra.gmra.mrb[0].mxu1 %vm301_vm4, %v300_v13 }
 0x27a   : > { %v375_v14 = vpop.f32.mrb[0].mxu1 }
 0x27b   : > { %v379_v15 = vsub.f32 0.0, %v375_v14  ;;  %v491_v16 = vpop.f32.mrb[1].mxu1 }
 0x27d   : > { %v380_v17 = vmul.f32 1.442695, %v379_v15 }
 0x27f   : > { %549 = vpow2.f32 %v380_v17 }
 0x289   : > { %v550_v18 = vpop.eup %549 }
 0x28a   : > { %v382_v19 = vadd.f32 1.0, %v550_v18 }
 0x28c   : > { %551 = vrcp.f32 %v382_v19 }
 0x296   : > { %v552_v20 = vpop.eup %551 }
 0x297   : > { %385 = vst.msk [vmem:[%s203_s9] sm:$0xff] %vm208_vm0, %v552_v20 }
 0x298 PF: > { %s16_s17 = sadd.s32 1, %s633_s17   ;;  %s801_s12 = smov %s617_s13 }
 0x299   : > { %p13_p9 = scmp.ge.s32.totalorder %s16_s17, 4   ;;  %s802_s13 = smov %s621_s14 }
 0x29a   : > { %s803_s14 = smov %s707_s24  ;;  %s804_s15 = smov %s629_s16 }
 0x29b   : > { %s805_s16 = smov %s807_s19  ;;  %15 = sbr.rel (!%p13_p9) target bundleno = 4 (0x4), region = 80 }
 0x2a2   :  { %405 = vsyncpa [#allocation4], 1 }
 0x2a3   :  { %407 = vsyncpa [#allocation4 + $0x1], 1 }

</bundles_post_ra>
